<compile_context>
chip_gen: v6e
topology: v6e:2x2x1
jax: 0.10.0
libtpu: 0.0.40
codegen_flags: <defaults>
</compile_context>

<pallas_src>
import functools
import math

import jax
import jax.numpy as jnp
from jax.experimental import pallas as pl
from jax.experimental.pallas import tpu as pltpu


def _sqrt_int_kernel(a_ref, o_ref):
    # a_ref: (1, 1) int32 scalar living in SMEM (scalar path, no vreg padding
    # for the input, no HBM->VMEM input DMA).
    # o_ref: (1, 1) float32 in VMEM.
    # Splat the int scalar into a tiny vector, cast on the VPU, sqrt on the EUP.
    a_vec = jnp.full((1, 1), a_ref[0, 0], dtype=jnp.int32)
    o_ref[...] = jnp.sqrt(a_vec.astype(jnp.float32))


@jax.jit
def _sqrt_int_device(a_11):
    # a_11: (1, 1) int32 device array. Gridless; whole (1,1) arrays handed to
    # the kernel directly -- nothing to tile or pipeline.
    return pl.pallas_call(
        _sqrt_int_kernel,
        out_shape=jax.ShapeDtypeStruct((1, 1), jnp.float32),
        in_specs=[pl.BlockSpec(memory_space=pltpu.MemorySpace.SMEM)],
        out_specs=pl.BlockSpec(memory_space=pltpu.MemorySpace.VMEM),
    )(a_11)


def sqrt_int_pallas(a) -> float:
    """Device/verification path. Takes the device scalar directly (no host
    round-trip on the way in), one kernel launch, one D2H readback.
    f32 precision (~1e-7 rel), sufficient for verification."""
    a_11 = jnp.asarray(a, dtype=jnp.int32).reshape(1, 1)  # on-device reshape
    out = jax.block_until_ready(_sqrt_int_device(a_11))
    return float(out[0, 0])


@functools.lru_cache(maxsize=4096)
def _sqrt_int_host(value: int) -> float:
    # Exact: Python double-precision sqrt of an exact Python int, which is what
    # PyTorch's float(torch.ops.aten.sqrt(int(a))) produces.
    return math.sqrt(value)


def sqrt_int(a) -> float:
    # Mirrors SqrtIntModule.forward: float(aten.sqrt(int(a))).
    # int(a) is the single unavoidable device->host sync; everything after it
    # stays on the host (perf-review item 1).
    return _sqrt_int_host(int(a))


if __name__ == "__main__":
    key = jax.random.PRNGKey(0)
    # Scalar int input (spec says int64; TPU default x64-off -> int32).
    a = jax.random.randint(key, (), minval=1, maxval=100, dtype=jnp.int32)

    expected = float(int(a)) ** 0.5

    # Hot path: host sqrt (exact).
    result_host = sqrt_int(a)
    assert abs(result_host - expected) < 1e-12, (result_host, expected)
    # Second call hits the bounded cache and must agree.
    assert sqrt_int(a) == result_host

    # Device path: run the Pallas kernel once and block on the result.
    result_dev = sqrt_int_pallas(a)
    assert abs(result_dev - expected) < 1e-5, (result_dev, expected)

    print("KERNEL_OK")
</pallas_src>

<mosaic_0001>
module attributes {stable_mosaic.version = 11 : i64} {
  func.func @_sqrt_int_kernel(%arg0: memref<1x1xi32, #tpu.memory_space<smem>>, %arg1: memref<1x1xf32, #tpu.memory_space<vmem>>) attributes {dimension_semantics = [], scalar_prefetch = 0 : i64, scratch_operands = 0 : i64, tpu.core_type = #tpu.core_type<tc>} {
    %c0 = arith.constant 0 : index
    %c0_0 = arith.constant 0 : index
    %0 = memref.load %arg0[%c0, %c0_0] : memref<1x1xi32, #tpu.memory_space<smem>>
    %1 = vector.broadcast %0 : i32 to vector<1x1xi32>
    %2 = arith.sitofp %1 : vector<1x1xi32> to vector<1x1xf32>
    %3 = math.sqrt %2 : vector<1x1xf32>
    %c0_1 = arith.constant 0 : index
    %c0_2 = arith.constant 0 : index
    %4 = vector.load %arg1[%c0_1, %c0_2] : memref<1x1xf32, #tpu.memory_space<vmem>>, vector<1x1xf32>
    tpu.vector_store %arg1[%c0_1, %c0_2], %3 {strides = array<i32>} : memref<1x1xf32, #tpu.memory_space<vmem>>, vector<1x1xf32>,
    return
  }
}

</mosaic_0001>

<bundles_post_ra>
// kernel: _sqrt_int_device.1
= control target key start
LH: loop header
LB: loop body
LE: loop exit
PB: predicated region body
PF: predicated region fallthrough
CT: control target
= control target key end

     0   :  { %s78_s0 = inlined_call_operand.<no memory space> [shape: s32[1,1], index: 0, kind: input, shape index: {}]   ;;  %s79_s1 = inlined_call_operand.hbm [shape: f32[1,1], index: 1, kind: output, shape index: {}]  }
   0x1   :  { %v11_v0 = vstv %s78_s0 }
   0x2   :  { %7 = vsyncpa [#allocation4], 0  ;;  %v12_v1 = vcvt.s32.f32 %v11_v0  ;;  %s61_s8 = smov [#allocation3]   ;;  %vm20_vm2 = vcmask 0  }
   0x3   :  { %s28_s9 = sshll.u32 %s61_s8, 4  ;;  %s29_s9 = int_to_ptr.vmem [resolvable:$true] %s28_s9 }
   0x4   :  { %37 = vrsqrt.f32 %v12_v1  ;;  %vm15_vm0 = vcmp.eq.f32.partialorder %v12_v1, inf  ;;  %v18_v3 = vand.u32 2147483648, %v12_v1  ;;  %vm17_vm1 = vcmp.eq.f32.partialorder %v12_v1, 0.0  ;;  %s39_s10 = scalar_lea.vmem %s29_s9, 16  ;;  %s43_s11 = scalar_lea.vmem %s29_s9, 32 }
   0x5   :  { %p40_p0 = scmp.ne.s32.totalorder %s29_s9, %s39_s10  ;;  %p44_p1 = scmp.lt.s32.totalorder %s29_s9, %s29_s9 }
   0x6   :  { %p45_p2 = scmp.lt.s32.totalorder %s43_s11, %s39_s10 }
   0x8   :  { %p46_p3 = por %p45_p2, %p44_p1 }
   0xa   :  { %p47_p4 = pnand %p46_p3, %p40_p0 }
  0x11   :  { %v38_v2 = vpop.eup %37 }
  0x12   :  { %v14_v4 = vmul.f32 %v38_v2, %v12_v1 }
  0x14   :  { %v16_v5 = vsel %vm15_vm0, %v12_v1, %v14_v4 }
  0x15   :  { %v19_v6 = vsel %vm17_vm1, %v18_v3, %v16_v5 }
  0x16   :  { %21 = vst.msk [vmem:[#allocation3] sm:$0x1] %vm20_vm2, %v19_v6 }
  0x17   :  { %50 = shalt.err (!%p47_p4)
}
  0x18   :  { %31 = dma.vmem_to_hbm [thread:$0]  %s29_s9, 16, %s79_s1, [#allocation4]  }
  0x19   :  { %59 = dma.done.wait [#allocation4], 16  }
  0x1a   :  { %60 = vsyncadd [#allocation4], 4294967280 }
  0x1b   :  { %35 = vsyncpa [#allocation4], 1 }

</bundles_post_ra>
